<compile_context>
chip_gen: v6e
topology: v6e:2x2x1
jax: 0.10.0
libtpu: 0.0.40
codegen_flags: <defaults>
</compile_context>

<pallas_src>
import jax
import jax.numpy as jnp
from jax.experimental import pallas as pl
from jax.experimental.pallas import tpu as pltpu

LANE = 128


def _round_up(v, m):
    return -(-v // m) * m


# ------------------------------ fused kernel ---------------------------------

def _fused_kernel(x_ref, w1_ref, b1_ref, w2_ref, b2_ref, o_ref):
    """Whole RClassifier0 forward for one batch block.

    The 5 linear FGL layers (sum pooling + channel mix, eval-mode dropout) and
    the first Linear of the head are folded into (w1_ref, b1_ref) at
    prepare_params() time, so per-sample work is two matmuls with f32
    accumulation and f32 bias adds (VPU), bf16 MXU operands.
    """
    h = jnp.dot(x_ref[...].astype(w1_ref.dtype), w1_ref[...],
                preferred_element_type=jnp.float32) + b1_ref[...]
    o = jnp.dot(h.astype(w2_ref.dtype), w2_ref[...],
                preferred_element_type=jnp.float32) + b2_ref[...]
    o_ref[...] = o.astype(o_ref.dtype)   # lane-dense 128-wide padded slab


# ------------------------------- parameters ----------------------------------

def init_params(key, node_sizes, channel_sizes, num_classes):
    """PyTorch-layout parameters (W: (out, in)), mirroring RegionFGL / nn.Linear."""
    ks = jax.random.split(key, 9)
    fgl = []
    for i in range(5):
        c_in, c_out = channel_sizes[i], channel_sizes[i + 1]
        w = jax.random.normal(ks[i], (c_out, c_in), jnp.float32) / jnp.sqrt(c_in)
        b = jnp.zeros((c_out,), jnp.float32)
        fgl.append((w, b))
    d = node_sizes[-1] * channel_sizes[-1]
    hid = channel_sizes[-1]
    w1 = jax.random.normal(ks[5], (hid, d), jnp.float32) / jnp.sqrt(d)
    b1 = 0.01 * jax.random.normal(ks[6], (hid,), jnp.float32)
    w2 = jax.random.normal(ks[7], (num_classes, hid), jnp.float32) / jnp.sqrt(hid)
    b2 = 0.01 * jax.random.normal(ks[8], (num_classes,), jnp.float32)
    return {"fgl": fgl, "fc": (w1, b1, w2, b2)}


def prepare_params(params, node_sizes, channel_sizes, num_classes,
                   weight_dtype=jnp.bfloat16):
    """One-time weight-only fold (done in f32, then quantized to bf16).

    FGL stack (contiguous-region sum pooling, linear channel mix, eval-mode
    dropout) + Linear #1 of the head  ->  (w1_eff, b1_eff);
    Linear #2 zero-padded to a 128-lane slab -> (w2_pad, b2_pad).
    """
    # The forward does x.unsqueeze(1): exactly one input channel.
    assert channel_sizes[0] == 1, "fold requires channel_sizes[0] == 1"
    rs = [node_sizes[i] // node_sizes[i + 1] for i in range(5)]
    assert all(node_sizes[i] == rs[i] * node_sizes[i + 1] for i in range(5)), \
        "node_sizes must shrink by integer factors (contiguous regions)"

    # ---- fold the 5 FGL layers: W_eff = W4@W3@W2@W1@W0, bias recurrence ------
    w_eff, b_eff = params["fgl"][0]                       # (c1, 1), (c1,)
    for i in range(1, 5):
        w_i, b_i = params["fgl"][i]
        b_eff = rs[i] * (w_i @ b_eff) + b_i               # pooling scales the constant
        w_eff = w_i @ w_eff                               # (c_{i+1}, 1)

    # ---- fold FGL output + (N,C,M).view(N,-1) flatten into Linear #1 ----------
    w1, b1, w2, b2 = params["fc"]
    hid = w1.shape[0]
    c_last, m_last = channel_sizes[-1], node_sizes[-1]
    r_total = node_sizes[0] // m_last                     # input nodes per final region
    w1r = w1.reshape(hid, c_last, m_last)                 # W1[k, c*M + j] == w1r[k, c, j]
    # A[j, k] = sum_c W1[k, c*M + j] * W_eff[c]
    a_jk = jnp.einsum("kcj,c->jk", w1r, w_eff[:, 0])      # (m_last, hid)
    w1_eff = jnp.repeat(a_jk, r_total, axis=0)            # (in_features, hid)
    b1_eff = b1 + jnp.einsum("kcj,c->k", w1r, b_eff)      # (hid,)

    # ---- pad to lane-dense (multiples of 128) slabs ----------------------------
    hid_pad = _round_up(hid, LANE)
    out_cols = _round_up(max(num_classes, 1), LANE)
    w1p = jnp.zeros((node_sizes[0], hid_pad), jnp.float32).at[:, :hid].set(w1_eff)
    b1p = jnp.zeros((1, hid_pad), jnp.float32).at[:, :hid].set(b1_eff)
    w2p = jnp.zeros((hid_pad, out_cols), jnp.float32).at[:hid, :num_classes].set(w2.T)
    b2p = jnp.zeros((1, out_cols), jnp.float32).at[:, :num_classes].set(b2)
    return {"w1": w1p.astype(weight_dtype), "b1": b1p,
            "w2": w2p.astype(weight_dtype), "b2": b2p}


# --------------------------------- forward -----------------------------------

def rclassifier0_forward(fused, x, num_classes, *, batch_block=128):
    """x: (N, in_features) float32 -> logits (N, num_classes) float32."""
    n, m0 = x.shape
    w1, b1, w2, b2 = fused["w1"], fused["b1"], fused["w2"], fused["b2"]
    assert w1.shape[0] == m0, "x feature dim must match folded weight"
    out_cols = w2.shape[-1]

    # Batch blocking: sublane-aligned blocks, pl.cdiv grid with a zero-padded
    # last block (no single mega-block fallback).  Keep the grid >= 2 so the
    # "parallel" batch axis can shard across v7x's two TensorCores.
    nb = max(8, min(batch_block, _round_up(pl.cdiv(n, 2), 8)))
    grid = pl.cdiv(n, nb)
    if n > 1:
        grid = max(grid, 2)
    n_pad = grid * nb
    if n_pad != n:
        x = jnp.pad(x, ((0, n_pad - n), (0, 0)))

    out = pl.pallas_call(
        _fused_kernel,
        out_shape=jax.ShapeDtypeStruct((n_pad, out_cols), jnp.float32),
        grid_spec=pltpu.PrefetchScalarGridSpec(
            num_scalar_prefetch=0,
            grid=(grid,),
            in_specs=[
                # lane-dense f32 input block, read from HBM once
                pl.BlockSpec((nb, m0), lambda i: (i, 0)),
                # grid-invariant folded weights/biases (constant index_map)
                pl.BlockSpec(w1.shape, lambda i: (0, 0)),
                pl.BlockSpec(b1.shape, lambda i: (0, 0)),
                pl.BlockSpec(w2.shape, lambda i: (0, 0)),
                pl.BlockSpec(b2.shape, lambda i: (0, 0)),
            ],
            out_specs=pl.BlockSpec((nb, out_cols), lambda i: (i, 0)),
        ),
        compiler_params=pltpu.CompilerParams(dimension_semantics=("parallel",)),
    )(x, w1, b1, w2, b2)
    return out[:n, :num_classes]


# ----------------------------- pure-JAX reference ----------------------------

def reference_forward(params, x, node_sizes, channel_sizes):
    """f32 layer-by-layer reference mirroring the PyTorch forward
    (contiguous equal-size regions, reduction='sum', eval-mode dropout)."""
    n = x.shape[0]
    cur = x[:, None, :]                                    # (N, 1, M0) ~ unsqueeze(1)
    for i in range(5):
        w, b = params["fgl"][i]
        m_out = node_sizes[i + 1]
        c_in = channel_sizes[i]
        r = node_sizes[i] // m_out
        pooled = cur.reshape(n, c_in, m_out, r).sum(-1)    # sum over contiguous region
        cur = jnp.einsum("oc,ncm->nom", w, pooled) + b[None, :, None]
    flat = cur.reshape(n, -1)                              # .view(N, -1) on (N, C, M)
    w1, b1, w2, b2 = params["fc"]
    h = flat @ w1.T + b1
    return h @ w2.T + b2


# ------------------------------------ main ------------------------------------

if __name__ == "__main__":
    # Structurally faithful, scaled-down sizes (original: z_size=128, ~1e5+ nodes):
    # nodes shrink each layer, channels grow; FC head: (M_last*C_last -> C_last -> classes).
    node_sizes = [512, 256, 128, 64, 32, 16]
    channel_sizes = [1, 2, 4, 8, 16, 32]
    num_classes = 10
    N = 2

    key = jax.random.PRNGKey(0)
    pkey, xkey = jax.random.split(key)
    params = init_params(pkey, node_sizes, channel_sizes, num_classes)
    fused = prepare_params(params, node_sizes, channel_sizes, num_classes,
                           weight_dtype=jnp.bfloat16)
    x = jax.random.normal(xkey, (N, node_sizes[0]), jnp.float32)

    out = rclassifier0_forward(fused, x, num_classes, batch_block=128)
    out = jax.block_until_ready(out)
    assert out.shape == (N, num_classes)
    assert out.dtype == jnp.float32
    assert bool(jnp.isfinite(out).all())

    ref = reference_forward(params, x, node_sizes, channel_sizes)
    max_err = float(jnp.max(jnp.abs(out - ref)))
    tol = 5e-2 * max(1.0, float(jnp.max(jnp.abs(ref))))
    assert max_err < tol, f"kernel/reference mismatch: max abs err {max_err} (tol {tol})"

    print("KERNEL_OK")
</pallas_src>

<mosaic_0001>
module attributes {stable_mosaic.version = 11 : i64} {
  func.func @_fused_kernel(%arg0: i32, %arg1: memref<8x512xf32, #tpu.memory_space<vmem>>, %arg2: memref<512x128xbf16, #tpu.memory_space<vmem>>, %arg3: memref<1x128xf32, #tpu.memory_space<vmem>>, %arg4: memref<128x128xbf16, #tpu.memory_space<vmem>>, %arg5: memref<1x128xf32, #tpu.memory_space<vmem>>, %arg6: memref<8x128xf32, #tpu.memory_space<vmem>>) attributes {dimension_semantics = [#tpu.dimension_semantics<parallel>], iteration_bounds = array<i64: 2>, scalar_prefetch = 0 : i64, scratch_operands = 0 : i64, tpu.core_type = #tpu.core_type<tc>, window_params = [{transform_indices = @transform_0, window_bounds = array<i64: 8, 512>}, {pipeline_mode = #tpu.pipeline_mode<synchronous>, transform_indices = @transform_1, window_bounds = array<i64: 512, 128>}, {pipeline_mode = #tpu.pipeline_mode<synchronous>, transform_indices = @transform_2, window_bounds = array<i64: 1, 128>}, {pipeline_mode = #tpu.pipeline_mode<synchronous>, transform_indices = @transform_3, window_bounds = array<i64: 128, 128>}, {pipeline_mode = #tpu.pipeline_mode<synchronous>, transform_indices = @transform_4, window_bounds = array<i64: 1, 128>}, {transform_indices = @transform_5, window_bounds = array<i64: 8, 128>}]} {
    %c0 = arith.constant 0 : index
    %c0_0 = arith.constant 0 : index
    %0 = vector.load %arg1[%c0, %c0_0] : memref<8x512xf32, #tpu.memory_space<vmem>>, vector<8x512xf32>
    %1 = arith.truncf %0 : vector<8x512xf32> to vector<8x512xbf16>
    %c0_1 = arith.constant 0 : index
    %c0_2 = arith.constant 0 : index
    %2 = vector.load %arg2[%c0_1, %c0_2] : memref<512x128xbf16, #tpu.memory_space<vmem>>, vector<512x128xbf16>
    %cst = arith.constant dense<0.000000e+00> : vector<8x128xf32>
    %3 = tpu.matmul %1, %2, %cst {dimension_numbers = #tpu.dot_dimension_numbers<[1], [0], [0], [1], [0, 0, 1, 1], [], []>} : vector<8x512xbf16>, vector<512x128xbf16>, vector<8x128xf32> -> vector<8x128xf32>
    %c0_3 = arith.constant 0 : index
    %c0_4 = arith.constant 0 : index
    %4 = vector.load %arg3[%c0_3, %c0_4] : memref<1x128xf32, #tpu.memory_space<vmem>>, vector<1x128xf32>
    %5 = vector.broadcast %4 : vector<1x128xf32> to vector<8x128xf32>
    %6 = arith.addf %3, %5 : vector<8x128xf32>
    %7 = arith.truncf %6 : vector<8x128xf32> to vector<8x128xbf16>
    %c0_5 = arith.constant 0 : index
    %c0_6 = arith.constant 0 : index
    %8 = vector.load %arg4[%c0_5, %c0_6] : memref<128x128xbf16, #tpu.memory_space<vmem>>, vector<128x128xbf16>
    %cst_7 = arith.constant dense<0.000000e+00> : vector<8x128xf32>
    %9 = tpu.matmul %7, %8, %cst_7 {dimension_numbers = #tpu.dot_dimension_numbers<[1], [0], [0], [1], [0, 0, 1, 1], [], []>} : vector<8x128xbf16>, vector<128x128xbf16>, vector<8x128xf32> -> vector<8x128xf32>
    %c0_8 = arith.constant 0 : index
    %c0_9 = arith.constant 0 : index
    %10 = vector.load %arg5[%c0_8, %c0_9] : memref<1x128xf32, #tpu.memory_space<vmem>>, vector<1x128xf32>
    %11 = vector.broadcast %10 : vector<1x128xf32> to vector<8x128xf32>
    %12 = arith.addf %9, %11 : vector<8x128xf32>
    %c0_10 = arith.constant 0 : index
    %c0_11 = arith.constant 0 : index
    %13 = vector.load %arg6[%c0_10, %c0_11] : memref<8x128xf32, #tpu.memory_space<vmem>>, vector<8x128xf32>
    tpu.vector_store %arg6[%c0_10, %c0_11], %12 {strides = array<i32>} : memref<8x128xf32, #tpu.memory_space<vmem>>, vector<8x128xf32>,
    return
  }
  func.func @transform_0(%arg0: i32) -> (i32, i32) {
    %c0_i32 = arith.constant 0 : i32
    %c0_i32_0 = arith.constant 0 : i32
    return %arg0, %c0_i32 : i32, i32
  }
  func.func @transform_1(%arg0: i32) -> (i32, i32) {
    %c0_i32 = arith.constant 0 : i32
    %c0_i32_0 = arith.constant 0 : i32
    %c0_i32_1 = arith.constant 0 : i32
    return %c0_i32, %c0_i32_0 : i32, i32
  }
  func.func @transform_2(%arg0: i32) -> (i32, i32) {
    %c0_i32 = arith.constant 0 : i32
    %c0_i32_0 = arith.constant 0 : i32
    %c0_i32_1 = arith.constant 0 : i32
    return %c0_i32, %c0_i32_0 : i32, i32
  }
  func.func @transform_3(%arg0: i32) -> (i32, i32) {
    %c0_i32 = arith.constant 0 : i32
    %c0_i32_0 = arith.constant 0 : i32
    %c0_i32_1 = arith.constant 0 : i32
    return %c0_i32, %c0_i32_0 : i32, i32
  }
  func.func @transform_4(%arg0: i32) -> (i32, i32) {
    %c0_i32 = arith.constant 0 : i32
    %c0_i32_0 = arith.constant 0 : i32
    %c0_i32_1 = arith.constant 0 : i32
    return %c0_i32, %c0_i32_0 : i32, i32
  }
  func.func @transform_5(%arg0: i32) -> (i32, i32) {
    %c0_i32 = arith.constant 0 : i32
    %c0_i32_0 = arith.constant 0 : i32
    return %arg0, %c0_i32 : i32, i32
  }
}

</mosaic_0001>

<bundles_post_ra>
// kernel: tpu_custom_call.1
= control target key start
LH: loop header
LB: loop body
LE: loop exit
PB: predicated region body
PF: predicated region fallthrough
CT: control target
= control target key end

     0   :  { %10 = vsyncpa [#allocation3], 0  ;;  %s1460_s0 = inlined_call_operand.hbm [shape: f32[16,512], index: 0, kind: input, shape index: {}]   ;;  %s1461_s1 = inlined_call_operand.hbm [shape: bf16[512,128], index: 1, kind: input, shape index: {}]   ;;  %s1462_s2 = inlined_call_operand.vmem [shape: f32[1,128], index: 2, kind: input, shape index: {}]   ;;  %s1463_s3 = inlined_call_operand.hbm [shape: bf16[128,128], index: 3, kind: input, shape index: {}]   ;;  %s1464_s4 = inlined_call_operand.vmem [shape: f32[1,128], index: 4, kind: input, shape index: {}]   ;;  %s1465_s5 = inlined_call_operand.hbm [shape: f32[16,128], index: 5, kind: output, shape index: {}]  }
   0x1   :  { %12 = vsyncpa [#allocation3 + $0x1], 0 }
   0x2   :  { %13 = vsyncpa [#allocation6], 0 }
   0x3   :  { %14 = vsyncpa [#allocation4], 0 }
   0x4   :  { %16 = vsyncpa [#allocation4 + $0x1], 0  ;;  %s1270_s18 = smov 0   ;;  %s1272_s19 = smov 0  }
   0x5   :  { %s1274_s20 = smov 0   ;;  %s1276_s21 = smov 0  }
   0x6 LB: > { %s1291_s22 = sadd.s32 4294967295, %s1230_s21   ;;  %s838_s23 = sadd.s32 4294967294, %s1230_s21   ;;  %s1230_s21 = sphi %s1276_s21, %s1487_s21   ;;  %s1226_s20 = sphi %s1274_s20, %s1486_s20   ;;  %s1222_s19 = sphi %s1272_s19, %s1485_s19   ;;  %s1218_s18 = sphi %s1270_s18, %s1484_s18  }
   0x7   : > { %p42_p0 = scmp.ne.s32.totalorder %s1222_s19, %s1218_s18  ;;  %p1466_p1 = scmp.eq.s32.totalorder %s1291_s22, 0 }
   0x8   : > { %p156_p3 = scmp.eq.s32.totalorder %s838_s23, 1  ;;  %p839_p5 = scmp.ge.s32.totalorder %s1230_s21, 1 }
   0x9   : > { %p1300_p4 = por %p1466_p1, %p42_p0  ;;  %p163_p7 = scmp.lt.s32.totalorder %s1230_s21, 3 }
   0xa   : > { %p1305_p6 = por %p156_p3, %p42_p0  ;;  %s1232_s27 = smov [#allocation5]  }
   0xb   : > { %s1470_s24 = scalar_select %p1300_p4, 1, 0 }
   0xc   : > { %s1471_s25 = scalar_select %p1305_p6, 1, 0 }
   0xd   : > { %p1310_p8 = pnand %p839_p5, %p163_p7  ;;  %s175_s28 = sshll.u32 %s1232_s27, 4  ;;  %s176_s28 = int_to_ptr.vmem [resolvable:$true] %s175_s28 }
   0xe   : > { %s1233_s30 = smov [#allocation7]   ;;  %s1093_s7 = scalar_lea.vmem %s176_s28, 4096 }
   0xf   : > { %s1472_s26 = scalar_select %p1310_p8, 1, 0 }
  0x10   : > { %p983_p9 = pneg %p1310_p8  ;;  %s191_s6 = sshll.u32 %s1233_s30, 4  ;;  %s192_s6 = int_to_ptr.vmem [resolvable:$true] %s191_s6 }
  0x11   : > { %p1094_p13 = scmp.ne.s32.totalorder %s176_s28, %s1093_s7  ;;  %p1101_p5 = scmp.lt.s32.totalorder %s176_s28, %s176_s28 }
  0x12   : > { %p1319_p11 = pnand %p983_p9, %p1466_p1  ;;  %p1102_p7 = scmp.lt.s32.totalorder %s1093_s7, %s1093_s7 }
  0x14   : > { %p1084_p12 = pneg %p1319_p11  ;;  %p1103_p10 = por %p1102_p7, %p1101_p5 }
  0x16   : > { %p1096_p0 = pnand %p1094_p13, %p1084_p12 }
  0x18   : > { %p1097_p3 = pneg %p1096_p0 }
  0x1a   : > { %p1104_p9 = pnand %p1103_p10, %p1097_p3 }
  0x1c   : > { %1107 = shalt.err (!%p1104_p9)
}
  0x1d   : > { %s1234_s8 = smov 64   ;;  %s1235_s9 = smov 4  }
  0x1e   : > { %986 = dma.hbm_to_vmem [thread:$0]  (!%p1319_p11), %s1461_s1, 4096, %s176_s28, [#allocation6], %s1234_s8, %s1234_s8, %s1235_s9  }
  0x1f   : > { %s1119_s12 = scalar_lea.vmem %s192_s6, 1024  ;;  %p1127_p2 = scmp.lt.s32.totalorder %s192_s6, %s192_s6 }
  0x20   : > { %p1120_p1 = scmp.ne.s32.totalorder %s192_s6, %s1119_s12  ;;  %p1128_p6 = scmp.lt.s32.totalorder %s1119_s12, %s1119_s12 }
  0x22   : > { %p1122_p13 = pnand %p1120_p1, %p1084_p12  ;;  %p1129_p5 = por %p1128_p6, %p1127_p2 }
  0x24   : > { %p1123_p0 = pneg %p1122_p13 }
  0x26   : > { %p1130_p10 = pnand %p1129_p5, %p1123_p0 }
  0x28   : > { %1133 = shalt.err (!%p1130_p10)
}
  0x29   : > { %989 = dma.hbm_to_vmem [thread:$0]  (!%p1319_p11), %s1463_s3, 1024, %s192_s6, [#allocation6], %s1234_s8, %s1234_s8, %s1235_s9  }
  0x2a   : > { %s1342_s15 = sadd.s32 1, %s1230_s21   ;;  %s29_s16 = sadd.s32 1, %s1226_s20 }
  0x2b   : > { %s26_s17 = ssub.s32 %s1230_s21, %s1342_s15  ;;  %p36_p1 = scmp.ne.s32.totalorder %s1226_s20, %s1222_s19 }
  0x2c   : > { %p27_p2 = scmp.eq.s32.totalorder %s26_s17, 0  ;;  %p37_p6 = scmp.eq.s32.totalorder %s1230_s21, 0 }
  0x2d   : > { %p1474_p12 = scmp.eq.s32.totalorder %s1291_s22, 1  ;;  %p1000_p7 = scmp.lt.s32.totalorder %s1230_s21, 2 }
  0x2e   : > { %s1358_s27 = scalar_select %p27_p2, %s1226_s20, %s29_s16  }
  0x2f   : > { %p1352_p3 = por %p1474_p12, %p36_p1  ;;  %p38_p9 = por %p37_p6, %p36_p1 }
  0x30   : > { %s208_s28 = sand.u32 1, %s1226_s20   ;;  %s897_s30 = sshll.u32 %s1230_s21, 9 }
  0x31   : > { %s1475_s23 = scalar_select %p1352_p3, 1, 0 }
  0x32   : > { %s843_s29 = sshll.u32 %s208_s28, 5  ;;  %s1365_s8 = scalar_lea.hbm %s1460_s0, %s897_s30 }
  0x33   : > { %s212_s9 = scalar_lea.vmem [#allocation2], %s843_s29  ;;  %p1367_p11 = pnand %p1000_p7, %p38_p9 }
  0x34   : > { %s220_s10 = sshll.u32 %s212_s9, 4  ;;  %s209_s12 = scalar_lea.sflag [#allocation3], %s208_s28  ;;  %s221_s10 = int_to_ptr.vmem [resolvable:$true] %s220_s10 }
  0x35   : > { %s1134_s13 = scalar_lea.hbm %s1365_s8, 512  ;;  %p1136_p0 = pneg %p1367_p11 }
  0x36   : > { %p1135_p13 = scmp.ne.s32.totalorder %s1365_s8, %s1134_s13  ;;  %s1139_s17 = scalar_lea.hbm %s1460_s0, 1024 }
  0x37   : > { %p1140_p1 = scmp.lt.s32.totalorder %s1365_s8, %s1460_s0  ;;  %p1141_p2 = scmp.lt.s32.totalorder %s1139_s17, %s1134_s13 }
  0x38   : > { %p1137_p5 = pnand %p1136_p0, %p1135_p13 }
  0x39   : > { %p1142_p6 = por %p1141_p2, %p1140_p1 }
  0x3a   : > { %p1138_p10 = pneg %p1137_p5 }
  0x3c   : > { %p1143_p12 = pnand %p1142_p6, %p1138_p10 }
  0x3e   : > { %1146 = shalt.err (!%p1143_p12)
}
  0x3f   : > { %s1147_s6 = scalar_lea.vmem %s221_s10, 512  ;;  %s1236_s28 = smov [#allocation2]  }
  0x40   : > { %p1148_p7 = scmp.ne.s32.totalorder %s221_s10, %s1147_s6  ;;  %s1152_s7 = sshll.u32 %s1236_s28, 4  ;;  %s1153_s7 = int_to_ptr.vmem [resolvable:$false] %s1152_s7 }
  0x41   : > { %s1154_s9 = scalar_lea.vmem %s1153_s7, 1024  ;;  %p1155_p13 = scmp.lt.s32.totalorder %s221_s10, %s1153_s7 }
  0x42   : > { %p1150_p9 = pnand %p1148_p7, %p1136_p0  ;;  %p1156_p5 = scmp.lt.s32.totalorder %s1154_s9, %s1147_s6 }
  0x44   : > { %p1151_p3 = pneg %p1150_p9  ;;  %p1157_p4 = por %p1156_p5, %p1155_p13 }
  0x46   : > { %p1158_p8 = pnand %p1157_p4, %p1151_p3 }
  0x48   : > { %1161 = shalt.err (!%p1158_p8)
}
  0x49   : > { %993 = dma.hbm_to_vmem [thread:$0]  (!%p1367_p11), %s1365_s8, 512, %s221_s10, %s209_s12  }
  0x4a   : > { %p1477_p10 = scmp.ne.s32.totalorder %s1472_s26, 0 }
  0x4b   : > { %s1388_s13 = sand.u32 (!%p1477_p10), 1, %s1222_s19   ;;  %p1478_p0 = scmp.ne.s32.totalorder (!%p1477_p10), %s1470_s24, 0 }
  0x4c   : > { %229 = sbr.rel (%p1477_p10) target bundleno = 531 (0x213), region = 40  ;;  %s847_s14 = sshll.u32 (!%p1477_p10), %s1388_s13, 5 }
  0x4d   : > { %s232_s16 = scalar_lea.sflag (!%p1477_p10), [#allocation3], %s1388_s13  ;;  %s1392_s17 = scalar_lea.vmem (!%p1477_p10), [#allocation2], %s847_s14 }
  0x51   : > { %1205 = dma.done.wait (%p1478_p0), %s232_s16, 512  }
  0x52   : > { %1207 = vsyncadd (%p1478_p0), %s232_s16, 4294966784  ;;  %p1479_p4 = scmp.eq.s32.totalorder %s1291_s22, 0 }
  0x54   : > { %1209 = dma.done.wait (%p1479_p4), [#allocation6], 5120   ;;  %p1480_p8 = pmov %p1479_p4 }
  0x55   : > { %v1042_v0 = vld [vmem:[#allocation5 + $0x78] sm:$0xff]   ;;  %v1046_v4 = vld [vmem:[#allocation5 + $0x70] sm:$0xff]   ;;  %v1050_v8 = vld [vmem:[#allocation5 + $0x68] sm:$0xff]   ;;  %v1237_v39 = vmov 0.0   ;;  %vm1238_vm0 = vmmov 0   ;;  %s850_s8 = sshll.u32 %s1388_s13, 3 }
  0x56   : > { %1211 = vsyncadd (%p1480_p8), [#allocation6], 4294962176  ;;  %v1043_v1 = vld [vmem:[#allocation5 + $0xf8] sm:$0xff]   ;;  %898 = vmatprep.subr.bf16.mxu0 %v1042_v0  ;;  %v1047_v5 = vld [vmem:[#allocation5 + $0xf0] sm:$0xff]   ;;  %s894_s12 = sshll.u32 %s1291_s22, 7  ;;  %s269_s30 = scalar_lea.vmem [#allocation8], %s850_s8 }
  0x57   : > { %v1044_v2 = vld [vmem:[#allocation5 + $0x38] sm:$0xff]   ;;  %920 = vmatprep.subr.bf16.mxu1 %v1043_v1  ;;  %v1048_v6 = vld [vmem:[#allocation5 + $0x30] sm:$0xff]   ;;  %v1051_v9 = vld [vmem:[#allocation5 + $0xe8] sm:$0xff]   ;;  %s749_s29 = sshll.u32 %s269_s30, 4  ;;  %s1417_s7 = scalar_lea.hbm %s1465_s5, %s894_s12  ;;  %s1419_s29 = int_to_ptr.vmem [resolvable:$true] %s749_s29 }
  0x58   : > { %v1045_v3 = vld [vmem:[#allocation5 + $0xb8] sm:$0xff]   ;;  %899 = vmatpush3.bf16.msra.mxu0 %v1044_v2  ;;  %v1049_v7 = vld [vmem:[#allocation5 + $0xb0] sm:$0xff]   ;;  %v1052_v10 = vld [vmem:[#allocation5 + $0x28] sm:$0xff]   ;;  %s736_s9 = scalar_lea.sflag [#allocation4], %s1388_s13  ;;  %s1162_s14 = scalar_lea.vmem %s1419_s29, 128 }
  0x59   : > { %921 = vmatpush3.bf16.msra.mxu1 %v1045_v3  ;;  %900 = vmatprep.subr.bf16.mxu0 %v1046_v4  ;;  %v1053_v11 = vld [vmem:[#allocation5 + $0xa8] sm:$0xff]   ;;  %v1054_v12 = vld [vmem:[#allocation5 + $0x60] sm:$0xff]   ;;  %v1058_v16 = vld [vmem:[#allocation5 + $0x58] sm:$0xff]   ;;  %p1163_p3 = scmp.ne.s32.totalorder %s1419_s29, %s1162_s14  ;;  %p1481_p11 = scmp.ne.s32.totalorder %s1475_s23, 0 }
  0x5a   : > { %922 = vmatprep.subr.bf16.mxu1 %v1047_v5  ;;  %v1055_v13 = vld [vmem:[#allocation5 + $0xe0] sm:$0xff]   ;;  %v1059_v17 = vld [vmem:[#allocation5 + $0xd8] sm:$0xff]   ;;  %v1062_v20 = vld [vmem:[#allocation5 + $0x50] sm:$0xff]   ;;  %s1239_s22 = smov [#allocation8]  }
  0x5b   : > { %v1056_v14 = vld [vmem:[#allocation5 + $0x20] sm:$0xff]   ;;  %v1060_v18 = vld [vmem:[#allocation5 + $0x18] sm:$0xff]   ;;  %v1063_v21 = vld [vmem:[#allocation5 + $0xd0] sm:$0xff]   ;;  %p1164_p1 = pnand %p1163_p3, %p1481_p11  ;;  %s1166_s16 = sshll.u32 %s1239_s22, 4  ;;  %s1167_s16 = int_to_ptr.vmem [resolvable:$false] %s1166_s16 }
  0x5c   : > { %901 = vmatpush3.bf16.msra.mxu0 %v1048_v6  ;;  %v1057_v15 = vld [vmem:[#allocation5 + $0xa0] sm:$0xff]   ;;  %v1061_v19 = vld [vmem:[#allocation5 + $0x98] sm:$0xff]   ;;  %v1064_v22 = vld [vmem:[#allocation5 + $0x10] sm:$0xff]   ;;  %p1169_p6 = scmp.lt.s32.totalorder %s1419_s29, %s1167_s16 }
  0x5d   : > { %923 = vmatpush3.bf16.msra.mxu1 %v1049_v7  ;;  %902 = vmatprep.subr.bf16.mxu0 %v1050_v8  ;;  %v1065_v23 = vld [vmem:[#allocation5 + $0x90] sm:$0xff]   ;;  %v1066_v24 = vld [vmem:[#allocation5 + $0x48] sm:$0xff]   ;;  %v1070_v28 = vld [vmem:[#allocation5 + $0x40] sm:$0xff]   ;;  %p1165_p2 = pneg %p1164_p1 }
  0x5e   : > { %924 = vmatprep.subr.bf16.mxu1 %v1051_v9  ;;  %v1067_v25 = vld [vmem:[#allocation5 + $0xc8] sm:$0xff]   ;;  %v1071_v29 = vld [vmem:[#allocation5 + $0xc0] sm:$0xff]   ;;  %v274_v33 = vld [vmem:[%s1392_s17 + $0x18] sm:$0xff] }
  0x5f   : > { %v1068_v26 = vld [vmem:[#allocation5 + $0x8] sm:$0xff]   ;;  %v1072_v30 = vld [vmem:[#allocation5] sm:$0xff]   ;;  %v278_v36 = vpack.c.bf16 %v274_v33, %v274_v33  ;;  %v273_v38 = vld [vmem:[%s1392_s17 + $0x10] sm:$0xff] }
  0x60   : > { %903 = vmatpush3.bf16.msra.mxu0 %v1052_v10  ;;  %v1069_v27 = vld [vmem:[#allocation5 + $0x88] sm:$0xff]   ;;  %v1073_v31 = vld [vmem:[#allocation5 + $0x80] sm:$0xff]   ;;  %v277_v40 = vpack.c.bf16 %v273_v38, %v273_v38  ;;  %v1074_v41 = vld [vmem:[#allocation7 + $0x38] sm:$0xff]  }
  0x61   : > { %925 = vmatpush3.bf16.msra.mxu1 %v1053_v11  ;;  %904 = vmatprep.subr.bf16.mxu0 %v1054_v12  ;;  %v272_v32 = vld [vmem:[%s1392_s17 + $0x8] sm:$0xff]  ;;  %v271_v34 = vld [vmem:[%s1392_s17] sm:$0xff]  ;;  %v1075_v42 = vld [vmem:[#allocation7 + $0x30] sm:$0xff]   ;;  %s1168_s17 = scalar_lea.vmem %s1167_s16, 256 }
  0x62   : > { %926 = vmatprep.subr.bf16.mxu1 %v1055_v13  ;;  %v276_v35 = vpack.c.bf16 %v272_v32, %v272_v32  ;;  %v275_v37 = vpack.c.bf16 %v271_v34, %v271_v34  ;;  %614 = vmatprep.mubr.bf16.mxu1 %v278_v36  ;;  %v1076_v43 = vld [vmem:[#allocation7 + $0x28] sm:$0xff]   ;;  %v1077_v44 = vld [vmem:[#allocation7 + $0x20] sm:$0xff]   ;;  %v1078_v45 = vld [vmem:[#allocation7 + $0x18] sm:$0xff]   ;;  %p1170_p12 = scmp.lt.s32.totalorder %s1168_s17, %s1162_s14 }
  0x63   : > { %v1079_v46 = vld [vmem:[#allocation7 + $0x10] sm:$0xff]   ;;  %v1080_v47 = vld [vmem:[#allocation7 + $0x8] sm:$0xff]   ;;  %v1081_v48 = vld [vmem:[#allocation7] sm:$0xff]  }
  0x64   : > { %905 = vmatpush3.bf16.msra.mxu0 %v1056_v14  ;;  %574 = vmatprep.mubr.bf16.mxu0 %v276_v35  ;;  %v851_v51 = vld [vmem:[%s1462_s2] ss:$0 sm:$0xff]  ;;  %p1171_p7 = por %p1170_p12, %p1169_p6 }
  0x65   : > { %927 = vmatpush3.bf16.msra.mxu1 %v1057_v15  ;;  %906 = vmatprep.subr.bf16.mxu0 %v1058_v16  ;;  %v884_v63 = vld [vmem:[%s1464_s4] ss:$0 sm:$0xff] }
  0x66   : > { %928 = vmatprep.subr.bf16.mxu1 %v1059_v17  ;;  %p1172_p9 = pnand %p1171_p7, %p1165_p2 }
  0x68   : > { %907 = vmatpush3.bf16.msra.mxu0 %v1060_v18 }
  0x69   : > { %929 = vmatpush3.bf16.msra.mxu1 %v1061_v19  ;;  %908 = vmatprep.subr.bf16.mxu0 %v1062_v20 }
  0x6a   : > { %930 = vmatprep.subr.bf16.mxu1 %v1063_v21 }
  0x6c   : > { %909 = vmatpush3.bf16.msra.mxu0 %v1064_v22 }
  0x6d   : > { %931 = vmatpush3.bf16.msra.mxu1 %v1065_v23  ;;  %910 = vmatprep.subr.bf16.mxu0 %v1066_v24 }
  0x6e   : > { %932 = vmatprep.subr.bf16.mxu1 %v1067_v25 }
  0x70   : > { %911 = vmatpush3.bf16.msra.mxu0 %v1068_v26 }
  0x71   : > { %933 = vmatpush3.bf16.msra.mxu1 %v1069_v27  ;;  %912 = vmatprep.subr.bf16.mxu0 %v1070_v28 }
  0x72   : > { %934 = vmatprep.subr.bf16.mxu1 %v1071_v29 }
  0x74   : > { %913 = vmatpush3.bf16.msra.mxu0 %v1072_v30 }
  0x75   : > { %935 = vmatpush3.bf16.msra.mxu1 %v1073_v31  ;;  %951 = vmatprep.subr.bf16.mxu0 %v1237_v39 }
  0x77   : > { %575 = vmatmul.mubr.bf16.vlgmr.msra.gmra.mxu0 %v275_v37 }
  0x78   : > { %615 = vmatmul.mubr.bf16.vlgmr.msra.gmra.mxu1 %v277_v40  ;;  %952 = vmatpush3.bf16.msra.mxu0 %v1074_v41 }
  0x79   : > { %953 = vmatprep.subr.bf16.mxu0 %v1237_v39  ;;  %967 = vmatprep.mubr.msk.bf16.mxu0 %vm1238_vm0, %v1237_v39 }
  0x7c   : > { %954 = vmatpush3.bf16.msra.mxu0 %v1075_v42 }
  0x7d   : > { %955 = vmatprep.subr.bf16.mxu0 %v1237_v39 }
  0x80   : > { %956 = vmatpush3.bf16.msra.mxu0 %v1076_v43 }
  0x81   : > { %957 = vmatprep.subr.bf16.mxu0 %v1237_v39 }
  0x84   : > { %958 = vmatpush3.bf16.msra.mxu0 %v1077_v44 }
  0x85   : > { %959 = vmatprep.subr.bf16.mxu0 %v1237_v39 }
  0x88   : > { %960 = vmatpush3.bf16.msra.mxu0 %v1078_v45 }
  0x89   : > { %961 = vmatprep.subr.bf16.mxu0 %v1237_v39 }
  0x8c   : > { %962 = vmatpush3.bf16.msra.mxu0 %v1079_v46 }
  0x8d   : > { %963 = vmatprep.subr.bf16.mxu0 %v1237_v39 }
  0x90   : > { %964 = vmatpush3.bf16.msra.mxu0 %v1080_v47 }
  0x91   : > { %965 = vmatprep.subr.bf16.mxu0 %v1237_v39 }
  0x94   : > { %966 = vmatpush3.bf16.msra.mxu0 %v1081_v48 }
 0x137   : > { %v914_v49 = vpop.f32.mrf.mxu0 }
 0x138   : > { %v936_v50 = vpop.f32.mrf.mxu1 }
 0x139   : > { %v915_v52 = vpop.f32.mrf.mxu0 }
 0x13a   : > { %v937_v53 = vpop.f32.mrf.mxu1  ;;  %v916_v54 = vadd.f32 %v915_v52, %v914_v49 }
 0x13b   : > { %v917_v55 = vpop.f32.mrf.mxu0  ;;  %v938_v58 = vadd.f32 %v937_v53, %v936_v50 }
 0x13c   : > { %v939_v56 = vpop.f32.mrf.mxu1  ;;  %v577_v57 = vadd.f32 %v916_v54, %v851_v51 }
 0x13d   : > { %v918_v59 = vpop.f32.mrf.mxu0 }
 0x13e   : > { %v940_v60 = vpop.f32.mrf.mxu1  ;;  %v617_v61 = vadd.f32 %v938_v58, %v577_v57 }
 0x140   : > { %v622_v62 = vpack.c.bf16 %v617_v61, %v617_v61 }
 0x142   : > { %968 = vmatmul.mubr.bf16.vlgmr.msra.gmra.mxu0 %v622_v62 }
 0x202   : > { %v728_v0 = vpop.f32.mrf.mxu0 }
 0x203   : > { %v729_v1 = vadd.f32 %v884_v63, %v728_v0 }
 0x204   : > { %v969_v2 = vpop.f32.mrf.mxu0 }
 0x205   : > { %734 = vst [vmem:[%s269_s30] sm:$0xff] %v729_v1 }
 0x206   : > { %v731_v3 = vpop.f32.mrf.mxu0 }
 0x207   : > { %1175 = shalt.err (!%p1172_p9)
}
 0x208   : > { %s1176_s24 = scalar_lea.hbm %s1417_s7, 128  ;;  %s1180_s8 = scalar_lea.hbm %s1465_s5, 256 }
 0x209   : > { %p1177_p13 = scmp.ne.s32.totalorder %s1417_s7, %s1176_s24  ;;  %p1181_p0 = scmp.lt.s32.totalorder %s1417_s7, %s1465_s5 }
 0x20a   : > { %p1182_p4 = scmp.lt.s32.totalorder %s1180_s8, %s1176_s24 }
 0x20b   : > { %p1178_p5 = pnand %p1177_p13, %p1481_p11 }
 0x20c   : > { %p1183_p8 = por %p1182_p4, %p1181_p0 }
 0x20d   : > { %p1179_p10 = pneg %p1178_p5 }
 0x20f   : > { %p1184_p3 = pnand %p1183_p8, %p1179_p10 }
 0x211   : > { %1187 = shalt.err (!%p1184_p3)
}
 0x212   : > { %981 = dma.vmem_to_hbm [thread:$0]  (%p1481_p11), %s1419_s29, 128, %s1417_s7, %s736_s9   ;;  %v970_v4 = vpop.f32.mrf.mxu0 }
 0x213 PF: > { %s761_s12 = sand.u32 1, %s1218_s18   ;;  %p1482_p1 = scmp.ne.s32.totalorder %s1471_s25, 0 }
 0x214   : > { %p1483_p2 = scmp.ge.s32.totalorder %s1230_s21, 2  ;;  %s762_s30 = scalar_lea.sflag [#allocation4], %s761_s12 }
 0x216   : > { %p995_p6 = pnand %p1483_p2, %p1482_p1 }
 0x218   : > { %p996_p12 = pneg %p995_p6 }
 0x21a   : > { %1213 = dma.done.wait (%p996_p12), %s762_s30, 128  }
 0x21b   : > { %1215 = vsyncadd (%p996_p12), %s762_s30, 4294967168  ;;  %p19_p7 = scmp.ge.s32.totalorder %s1342_s15, 4   ;;  %s1484_s18 = smov %s1222_s19 }
 0x21c   : > { %s1485_s19 = smov %s1226_s20  ;;  %s1486_s20 = smov %s1358_s27 }
 0x21d   : > { %s1487_s21 = smov %s1342_s15  ;;  %21 = sbr.rel (!%p19_p7) target bundleno = 6 (0x6), region = 93 }
 0x222   :  { %767 = vsyncpa [#allocation3], 1 }
 0x223   :  { %769 = vsyncpa [#allocation3 + $0x1], 1 }
 0x224   :  { %770 = vsyncpa [#allocation6], 1 }
 0x225   :  { %771 = vsyncpa [#allocation4], 1 }
 0x226   :  { %773 = vsyncpa [#allocation4 + $0x1], 1 }

</bundles_post_ra>
